<compile_context>
chip_gen: v7x
topology: tpu7x:2x2x1
jax: 0.10.0
libtpu: 0.0.40
codegen_flags: <defaults>
</compile_context>

<pallas_src>
import functools

import jax
import jax.numpy as jnp
from jax.experimental import pallas as pl
from jax.experimental.pallas import tpu as pltpu


def _round_up(x: int, m: int) -> int:
    return ((x + m - 1) // m) * m


def _cdiv(a: int, b: int) -> int:
    return (a + b - 1) // b


def _fused_mlp_kernel(*refs, num_layers: int, relu_flags):
    # refs = (x_ref, w0_ref, b0_ref, w1_ref, b1_ref, ..., o_ref)
    # x_ref: (TB, K0)   w_l: (K_l, N_l) bf16   b_l: (1, N_l) f32   o_ref: (TB, N_last)
    x_ref = refs[0]
    o_ref = refs[-1]
    h = x_ref[...]
    for l in range(num_layers):
        w_ref = refs[1 + 2 * l]
        b_ref = refs[2 + 2 * l]
        # bf16 operands into the MXU, f32 accumulation.
        acc = jnp.dot(h.astype(w_ref.dtype), w_ref[...],
                      preferred_element_type=jnp.float32)
        acc = acc + b_ref[...]              # f32 bias, broadcast over rows
        if relu_flags[l]:
            acc = jnp.maximum(acc, 0.0)
        h = acc                             # stays f32 between layers
    o_ref[...] = h.astype(o_ref.dtype)


# Once the (8-rounded) batch reaches this many rows, force >= 2 grid steps so
# v7x's two TensorCores can both participate via the "parallel" axis.
_MIN_SPLIT_ROWS = 256


@functools.partial(jax.jit, static_argnames=("relu_flags", "tb_max"))
def mlp_forward(x, params, relu_flags, tb_max: int = 2048):
    """Fused MLP forward.  x: (B, K0); params: tuple of (w:(K,N) bf16, b:(1,N) f32)."""
    B, K0 = x.shape
    num_layers = len(params)
    n_out = params[-1][0].shape[1]

    assert tb_max % 8 == 0, "tb_max must be a multiple of 8"
    # Split the batch into near-equal 8-row-aligned tiles:
    #   * n_tiles = cdiv(B, tb_max) bounds padding waste to <= 8 rows per tile
    #     (no pathological ~2x round-up just above a tile boundary).
    #   * force >= 2 tiles for large batches so the "parallel" grid axis can be
    #     sharded across both TensorCores on v7x.
    B8 = _round_up(B, 8)
    n_tiles = _cdiv(B8, tb_max)
    if B8 >= _MIN_SPLIT_ROWS:
        n_tiles = max(n_tiles, 2)
    TB = _round_up(_cdiv(B8, n_tiles), 8)          # TB <= tb_max by construction
    B_pad = n_tiles * TB
    x_p = jnp.pad(x, ((0, B_pad - B), (0, 0))) if B_pad != B else x

    kernel = functools.partial(
        _fused_mlp_kernel, num_layers=num_layers, relu_flags=relu_flags)

    in_specs = [pl.BlockSpec((TB, K0), lambda i: (i, 0))]
    flat_args = [x_p]
    for (w, b) in params:
        k, n = w.shape
        # Constant index_map -> weights/biases stay resident in VMEM across
        # all batch tiles (tiny: ~25 KB total here).
        in_specs.append(pl.BlockSpec((k, n), lambda i: (0, 0)))
        in_specs.append(pl.BlockSpec((1, n), lambda i: (0, 0)))
        flat_args += [w, b]

    out = pl.pallas_call(
        kernel,
        out_shape=jax.ShapeDtypeStruct((B_pad, n_out), x.dtype),
        grid=(n_tiles,),
        in_specs=in_specs,
        out_specs=pl.BlockSpec((TB, n_out), lambda i: (i, 0)),
        compiler_params=pltpu.CompilerParams(
            dimension_semantics=("parallel",),
            # Explicit limit so big tiles never trip v5e's 16 MiB default
            # scoped-VMEM; 32 MiB is safe on v5e/v6e/v7x alike.
            vmem_limit_bytes=32 * 1024 * 1024),
    )(*flat_args)

    out = out[:B]
    # _out.view(x.size(0), -1)
    return out.reshape(B, -1)


class MLPPallas:
    """Mirror of the PyTorch MLP: sequential Linear(+ReLU) layers, flatten."""

    def __init__(self, layer_sizes, key, compute_dtype=jnp.bfloat16):
        num_layers = len(layer_sizes) - 1
        ws, bs, relu_flags = [], [], []
        for fan_in, fan_out in zip(layer_sizes[:-1], layer_sizes[1:]):
            kw, kb, key = jax.random.split(key, 3)
            bound = 1.0 / float(fan_in) ** 0.5      # PyTorch default Linear init
            w = jax.random.uniform(kw, (fan_out, fan_in), jnp.float32,
                                   minval=-bound, maxval=bound)
            b = jax.random.uniform(kb, (fan_out,), jnp.float32,
                                   minval=-bound, maxval=bound)
            ws.append(jnp.asarray(w.T))             # pre-transposed (K, N)
            bs.append(b.reshape(1, fan_out))        # 2-D bias (1, N)
            relu_flags.append(True)

        # Pad every *hidden* width up to a multiple of 128 lanes.  Free: the
        # hidden activation is lane-padded to 128 in vregs/VMEM anyway.  Zero
        # cols of w_l / zero bias tail give zero activations; zero rows of
        # w_{l+1} keep them inert -> numerics unchanged.
        for l in range(num_layers - 1):
            n = ws[l].shape[1]
            n_pad = _round_up(n, 128)
            if n_pad != n:
                ws[l] = jnp.pad(ws[l], ((0, 0), (0, n_pad - n)))
                bs[l] = jnp.pad(bs[l], ((0, 0), (0, n_pad - n)))
                ws[l + 1] = jnp.pad(ws[l + 1], ((0, n_pad - n), (0, 0)))

        # bf16 weights (half the weight DMA, native MXU dtype); biases stay
        # f32 because they are added to the f32 accumulator.
        self.params = tuple(
            (w.astype(compute_dtype), b) for w, b in zip(ws, bs))
        self.relu_flags = tuple(relu_flags)

    def __call__(self, x, *, tb_max: int = 2048):
        return mlp_forward(x, self.params, self.relu_flags, tb_max=tb_max)


if __name__ == "__main__":
    key = jax.random.PRNGKey(0)
    k_in, k_params = jax.random.split(key)

    d_in, d_hidden, d_out = 32, 64, 32
    mlp = MLPPallas([d_in, d_hidden, d_out], k_params)

    def ref_forward(x):
        # Matched-precision reference: bf16 operands, f32 accumulation (same
        # contraction precision as the MXU path in the kernel).
        h = x
        for l, (w, b) in enumerate(mlp.params):
            h32 = jnp.dot(h.astype(jnp.bfloat16).astype(jnp.float32),
                          w.astype(jnp.float32)) + b
            if mlp.relu_flags[l]:
                h32 = jnp.maximum(h32, 0.0)
            h = h32
        return h.astype(x.dtype).reshape(x.shape[0], -1)

    # (a) f32 input, batch large enough that the grid gets >= 2 steps
    #     (v7x megacore split): B8=256 -> 2 tiles of 128 rows.
    x_a = jax.random.normal(k_in, (256, d_in), jnp.float32)
    y_a = jax.block_until_ready(mlp(x_a))
    assert y_a.shape == (256, d_out) and y_a.dtype == jnp.float32
    assert jnp.allclose(y_a, ref_forward(x_a), atol=2e-3, rtol=2e-3)

    # (b) tiny, non-multiple-of-8 batch (padding path, grid=(1,))
    x_b = jax.random.normal(jax.random.PRNGKey(1), (5, d_in), jnp.float32)
    y_b = jax.block_until_ready(mlp(x_b))
    assert y_b.shape == (5, d_out)
    assert jnp.allclose(y_b, ref_forward(x_b), atol=2e-3, rtol=2e-3)

    # (c) multi-tile with a non-divisible tail and a small tb_max:
    #     B=100 -> 2 tiles of 56 rows, only 12 padded rows of waste.
    x_c = jax.random.normal(jax.random.PRNGKey(2), (100, d_in), jnp.float32)
    y_c = jax.block_until_ready(mlp(x_c, tb_max=64))
    assert y_c.shape == (100, d_out)
    assert jnp.allclose(y_c, ref_forward(x_c), atol=2e-3, rtol=2e-3)

    # (d) bf16 input end-to-end: halves x/out HBM traffic (the intended
    #     production path when the producer/consumer run in bf16).
    x_d = x_a.astype(jnp.bfloat16)
    y_d = jax.block_until_ready(mlp(x_d))
    assert y_d.shape == (256, d_out) and y_d.dtype == jnp.bfloat16
    assert jnp.allclose(y_d.astype(jnp.float32),
                        ref_forward(x_d).astype(jnp.float32),
                        atol=3e-2, rtol=2e-2)

    print("KERNEL_OK")
</pallas_src>

<mosaic_0001>
module attributes {stable_mosaic.version = 11 : i64} {
  func.func @_fused_mlp_kernel(%arg0: i32, %arg1: memref<128x32xf32, #tpu.memory_space<vmem>>, %arg2: memref<32x128xbf16, #tpu.memory_space<vmem>>, %arg3: memref<1x128xf32, #tpu.memory_space<vmem>>, %arg4: memref<128x32xbf16, #tpu.memory_space<vmem>>, %arg5: memref<1x32xf32, #tpu.memory_space<vmem>>, %arg6: memref<128x32xf32, #tpu.memory_space<vmem>>) attributes {dimension_semantics = [#tpu.dimension_semantics<parallel>], iteration_bounds = array<i64: 2>, scalar_prefetch = 0 : i64, scratch_operands = 0 : i64, tpu.core_type = #tpu.core_type<tc>, window_params = [{transform_indices = @transform_0, window_bounds = array<i64: 128, 32>}, {pipeline_mode = #tpu.pipeline_mode<synchronous>, transform_indices = @transform_1, window_bounds = array<i64: 32, 128>}, {pipeline_mode = #tpu.pipeline_mode<synchronous>, transform_indices = @transform_2, window_bounds = array<i64: 1, 128>}, {pipeline_mode = #tpu.pipeline_mode<synchronous>, transform_indices = @transform_3, window_bounds = array<i64: 128, 32>}, {pipeline_mode = #tpu.pipeline_mode<synchronous>, transform_indices = @transform_4, window_bounds = array<i64: 1, 32>}, {transform_indices = @transform_5, window_bounds = array<i64: 128, 32>}]} {
    %c0 = arith.constant 0 : index
    %c0_0 = arith.constant 0 : index
    %0 = vector.load %arg1[%c0, %c0_0] : memref<128x32xf32, #tpu.memory_space<vmem>>, vector<128x32xf32>
    %1 = arith.truncf %0 : vector<128x32xf32> to vector<128x32xbf16>
    %c0_1 = arith.constant 0 : index
    %c0_2 = arith.constant 0 : index
    %2 = vector.load %arg2[%c0_1, %c0_2] : memref<32x128xbf16, #tpu.memory_space<vmem>>, vector<32x128xbf16>
    %cst = arith.constant dense<0.000000e+00> : vector<128x128xf32>
    %3 = tpu.matmul %1, %2, %cst {dimension_numbers = #tpu.dot_dimension_numbers<[1], [0], [0], [1], [0, 0, 1, 1], [], []>} : vector<128x32xbf16>, vector<32x128xbf16>, vector<128x128xf32> -> vector<128x128xf32>
    %c0_3 = arith.constant 0 : index
    %c0_4 = arith.constant 0 : index
    %4 = vector.load %arg3[%c0_3, %c0_4] : memref<1x128xf32, #tpu.memory_space<vmem>>, vector<1x128xf32>
    %5 = vector.broadcast %4 : vector<1x128xf32> to vector<128x128xf32>
    %6 = arith.addf %3, %5 : vector<128x128xf32>
    %cst_5 = arith.constant 0.000000e+00 : f32
    %7 = vector.broadcast %cst_5 : f32 to vector<128x128xf32>
    %8 = arith.maximumf %6, %7 : vector<128x128xf32>
    %9 = arith.truncf %8 : vector<128x128xf32> to vector<128x128xbf16>
    %c0_6 = arith.constant 0 : index
    %c0_7 = arith.constant 0 : index
    %10 = vector.load %arg4[%c0_6, %c0_7] : memref<128x32xbf16, #tpu.memory_space<vmem>>, vector<128x32xbf16>
    %cst_8 = arith.constant dense<0.000000e+00> : vector<128x32xf32>
    %11 = tpu.matmul %9, %10, %cst_8 {dimension_numbers = #tpu.dot_dimension_numbers<[1], [0], [0], [1], [0, 0, 1, 1], [], []>} : vector<128x128xbf16>, vector<128x32xbf16>, vector<128x32xf32> -> vector<128x32xf32>
    %c0_9 = arith.constant 0 : index
    %c0_10 = arith.constant 0 : index
    %12 = vector.load %arg5[%c0_9, %c0_10] : memref<1x32xf32, #tpu.memory_space<vmem>>, vector<1x32xf32>
    %13 = vector.broadcast %12 : vector<1x32xf32> to vector<128x32xf32>
    %14 = arith.addf %11, %13 : vector<128x32xf32>
    %cst_11 = arith.constant 0.000000e+00 : f32
    %15 = vector.broadcast %cst_11 : f32 to vector<128x32xf32>
    %16 = arith.maximumf %14, %15 : vector<128x32xf32>
    %c0_12 = arith.constant 0 : index
    %c0_13 = arith.constant 0 : index
    %17 = vector.load %arg6[%c0_12, %c0_13] : memref<128x32xf32, #tpu.memory_space<vmem>>, vector<128x32xf32>
    tpu.vector_store %arg6[%c0_12, %c0_13], %16 {strides = array<i32>} : memref<128x32xf32, #tpu.memory_space<vmem>>, vector<128x32xf32>,
    return
  }
  func.func @transform_0(%arg0: i32) -> (i32, i32) {
    %c0_i32 = arith.constant 0 : i32
    %c0_i32_0 = arith.constant 0 : i32
    return %arg0, %c0_i32 : i32, i32
  }
  func.func @transform_1(%arg0: i32) -> (i32, i32) {
    %c0_i32 = arith.constant 0 : i32
    %c0_i32_0 = arith.constant 0 : i32
    %c0_i32_1 = arith.constant 0 : i32
    return %c0_i32, %c0_i32_0 : i32, i32
  }
  func.func @transform_2(%arg0: i32) -> (i32, i32) {
    %c0_i32 = arith.constant 0 : i32
    %c0_i32_0 = arith.constant 0 : i32
    %c0_i32_1 = arith.constant 0 : i32
    return %c0_i32, %c0_i32_0 : i32, i32
  }
  func.func @transform_3(%arg0: i32) -> (i32, i32) {
    %c0_i32 = arith.constant 0 : i32
    %c0_i32_0 = arith.constant 0 : i32
    %c0_i32_1 = arith.constant 0 : i32
    return %c0_i32, %c0_i32_0 : i32, i32
  }
  func.func @transform_4(%arg0: i32) -> (i32, i32) {
    %c0_i32 = arith.constant 0 : i32
    %c0_i32_0 = arith.constant 0 : i32
    %c0_i32_1 = arith.constant 0 : i32
    return %c0_i32, %c0_i32_0 : i32, i32
  }
  func.func @transform_5(%arg0: i32) -> (i32, i32) {
    %c0_i32 = arith.constant 0 : i32
    %c0_i32_0 = arith.constant 0 : i32
    return %arg0, %c0_i32 : i32, i32
  }
}

</mosaic_0001>

<bundles_post_ra>
// kernel: mlp_forward.1
= control target key start
LH: loop header
LB: loop body
LE: loop exit
PB: predicated region body
PF: predicated region fallthrough
CT: control target
= control target key end

     0   :  { %s859_s18 = smov 0   ;;  %s979_s0 = inlined_call_operand.vmem [shape: f32[256,32], index: 0, kind: input, shape index: {}]   ;;  %s980_s1 = inlined_call_operand.vmem [shape: bf16[32,128], index: 1, kind: input, shape index: {}]   ;;  %s981_s2 = inlined_call_operand.vmem [shape: f32[1,128], index: 2, kind: input, shape index: {}]   ;;  %s982_s3 = inlined_call_operand.vmem [shape: bf16[128,32], index: 3, kind: input, shape index: {}]   ;;  %s983_s4 = inlined_call_operand.vmem [shape: f32[1,32], index: 4, kind: input, shape index: {}]   ;;  %s984_s5 = inlined_call_operand.vmem [shape: f32[256,32], index: 5, kind: output, shape index: {}]  }
   0x1 LB: > { %s678_s19 = sadd.s32 4294967295, %s827_s18   ;;  %p682_p0 = scmp.ge.s32.totalorder %s827_s18, 1  ;;  %s827_s18 = sphi %s859_s18, %s15_s18  }
   0x2   : > { %p188_p1 = scmp.lt.s32.totalorder %s827_s18, 3 }
   0x4   : > { %p189_p2 = pnand %p682_p0, %p188_p1 }
   0x5   : > { %v811_v0 = vld [vmem:[%s980_s1] sm:$0xff] (!%p189_p2)   ;;  %s683_s22 = sshll.u32 (!%p189_p2), %s678_s19, 4  ;;  %v812_v1 = vld [vmem:[%s980_s1 + $0x8] sm:$0xff] (!%p189_p2)   ;;  %v815_v4 = vld [vmem:[%s982_s3 + $0x10] sm:$0xff] (!%p189_p2)   ;;  %vm276_vm0 = vcmask (!%p189_p2), 261120  }
   0x6   : > { %192 = sbr.rel (%p189_p2) target bundleno = 486 (0x1e6), region = 40  ;;  %p217_p3 = scmp.lt.s32.totalorder (!%p189_p2), %s683_s22, 31  ;;  %735 = vmatprep.subr.bf16.mxu0 (!%p189_p2), %v811_v0  ;;  %v813_v2 = vld [vmem:[%s982_s3] sm:$0xff] (!%p189_p2)   ;;  %v814_v3 = vld [vmem:[%s982_s3 + $0x8] sm:$0xff] (!%p189_p2)   ;;  %v816_v16 = vld [vmem:[%s982_s3 + $0x18] sm:$0xff] (!%p189_p2)  }
   0x7   : > { %736 = vmatpush3.bf16.msra.mxu0 (!%p189_p2), %v811_v0  ;;  %787 = vmatprep.subr.bf16.mxu1 (!%p189_p2), %v813_v2  ;;  %v817_v21 = vld [vmem:[%s982_s3 + $0x20] sm:$0xff] (!%p189_p2)   ;;  %v818_v24 = vld [vmem:[%s982_s3 + $0x28] sm:$0xff] (!%p189_p2)   ;;  %v819_v32 = vld [vmem:[%s982_s3 + $0x30] sm:$0xff] (!%p189_p2)  }
   0x8   : > { %737 = vmatprep.subr.bf16.mxu0 (!%p189_p2), %v812_v1  ;;  %795 = vmatpush3.bf16.msra.mxu1 (!%p189_p2), %v813_v2  ;;  %v820_v33 = vld [vmem:[%s982_s3 + $0x38] sm:$0xff] (!%p189_p2)   ;;  %v687_v34 = vld [vmem:[%s981_s2] ss:$0 sm:$0xff] (!%p189_p2) }
   0x9   : > { %788 = vmatprep.subr.bf16.mxu1 (!%p189_p2), %v814_v3 }
   0xb   : > { %738 = vmatpush3.bf16.msra.mxu0 (!%p189_p2), %v812_v1 }
   0xc   : > { %755 = vmatprep.subr.bf16.mxu0 (!%p189_p2), %v813_v2  ;;  %796 = vmatpush3.bf16.msra.mxu1 (!%p189_p2), %v814_v3 }
   0xd   : > { %s986_s22 = smov (!%p217_p3, %s683_s22), 31  ;;  %789 = vmatprep.subr.bf16.mxu1 %v815_v4 }
   0xe   : > { %s684_s29 = sshll.u32 %s986_s22, 3 }
   0xf   : > { %s887_s7 = scalar_lea.vmem %s979_s0, %s684_s29  ;;  %s942_s28 = scalar_lea.vmem %s984_s5, %s684_s29 }
  0x10   : > { %v229_v5 = vld [vmem:[%s887_s7] sm:$0xff]  ;;  %v230_v6 = vld [vmem:[%s887_s7 + $0x8] sm:$0xff]  ;;  %v231_v7 = vld [vmem:[%s887_s7 + $0x10] sm:$0xff]  ;;  %797 = vmatpush3.bf16.msra.mxu1 %v815_v4 }
  0x11   : > { %v245_v8 = vpack.c.bf16 %v230_v6, %v229_v5  ;;  %v232_v9 = vld [vmem:[%s887_s7 + $0x18] sm:$0xff]  ;;  %v233_v10 = vld [vmem:[%s887_s7 + $0x20] sm:$0xff]  ;;  %v234_v11 = vld [vmem:[%s887_s7 + $0x28] sm:$0xff]  ;;  %790 = vmatprep.subr.bf16.mxu1 %v816_v16 }
  0x12   : > { %v246_v12 = vpack.c.bf16 %v232_v9, %v231_v7  ;;  %v247_v13 = vpack.c.bf16 %v234_v11, %v233_v10  ;;  %v235_v14 = vld [vmem:[%s887_s7 + $0x30] sm:$0xff]  ;;  %v236_v15 = vld [vmem:[%s887_s7 + $0x38] sm:$0xff]  ;;  %v237_v17 = vld [vmem:[%s887_s7 + $0x40] sm:$0xff] }
  0x13   : > { %739 = vmatprep.mubr.msk.bf16.mxu0 %vm276_vm0, %v245_v8  ;;  %v238_v18 = vld [vmem:[%s887_s7 + $0x48] sm:$0xff]  ;;  %v248_v19 = vpack.c.bf16 %v236_v15, %v235_v14  ;;  %v239_v22 = vld [vmem:[%s887_s7 + $0x50] sm:$0xff]  ;;  %v240_v23 = vld [vmem:[%s887_s7 + $0x58] sm:$0xff] }
  0x14   : > { %740 = vmatmul.mubr.msk.bf16.vlgmr.msra.gmra.mrb[0].mxu0 %vm276_vm0, %v246_v12  ;;  %v249_v20 = vpack.c.bf16 %v238_v18, %v237_v17  ;;  %798 = vmatpush3.bf16.msra.mxu1 %v816_v16  ;;  %v241_v25 = vld [vmem:[%s887_s7 + $0x60] sm:$0xff]  ;;  %v242_v26 = vld [vmem:[%s887_s7 + $0x68] sm:$0xff]  ;;  %v250_v27 = vpack.c.bf16 %v240_v23, %v239_v22  ;;  %v243_v29 = vld [vmem:[%s887_s7 + $0x70] sm:$0xff] }
  0x15   : > { %743 = vmatprep.mubr.msk.bf16.mxu0 %vm276_vm0, %v247_v13  ;;  %756 = vmatpush3.bf16.msra.mxu0 %v813_v2  ;;  %v251_v28 = vpack.c.bf16 %v242_v26, %v241_v25  ;;  %v244_v30 = vld [vmem:[%s887_s7 + $0x78] sm:$0xff] }
  0x16   : > { %757 = vmatprep.subr.bf16.mxu0 %v814_v3  ;;  %791 = vmatprep.subr.bf16.mxu1 %v817_v21  ;;  %v252_v31 = vpack.c.bf16 %v244_v30, %v243_v29 }
  0x18   : > { %799 = vmatpush3.bf16.msra.mxu1 %v817_v21 }
  0x19   : > { %758 = vmatpush3.bf16.msra.mxu0 %v814_v3  ;;  %792 = vmatprep.subr.bf16.mxu1 %v818_v24 }
  0x1a   : > { %759 = vmatprep.subr.bf16.mxu0 %v815_v4 }
  0x1c   : > { %744 = vmatmul.mubr.msk.bf16.gmra.mrb[4].mxu0 %vm276_vm0, %v248_v19  ;;  %800 = vmatpush3.bf16.msra.mxu1 %v818_v24 }
  0x1d   : > { %747 = vmatprep.mubr.msk.bf16.mxu0 %vm276_vm0, %v249_v20  ;;  %760 = vmatpush3.bf16.msra.mxu0 %v815_v4 }
  0x1e   : > { %761 = vmatprep.subr.bf16.mxu0 %v816_v16  ;;  %793 = vmatprep.subr.bf16.mxu1 %v819_v32 }
  0x20   : > { %801 = vmatpush3.bf16.msra.mxu1 %v819_v32 }
  0x21   : > { %762 = vmatpush3.bf16.msra.mxu0 %v816_v16  ;;  %794 = vmatprep.subr.bf16.mxu1 %v820_v33 }
  0x22   : > { %763 = vmatprep.subr.bf16.mxu0 %v817_v21 }
  0x24   : > { %748 = vmatmul.mubr.msk.bf16.gmra.mrb[8].mxu0 %vm276_vm0, %v250_v27  ;;  %802 = vmatpush3.bf16.msra.mxu1 %v820_v33  ;;  %v698_v27 = vld [vmem:[%s983_s4] ss:$0 sm:$0xff] }
  0x25   : > { %751 = vmatprep.mubr.msk.bf16.mxu0 %vm276_vm0, %v251_v28  ;;  %764 = vmatpush3.bf16.msra.mxu0 %v817_v21 }
  0x26   : > { %765 = vmatprep.subr.bf16.mxu0 %v818_v24 }
  0x29   : > { %766 = vmatpush3.bf16.msra.mxu0 %v818_v24 }
  0x2a   : > { %767 = vmatprep.subr.bf16.mxu0 %v819_v32 }
  0x2c   : > { %752 = vmatmul.mubr.msk.bf16.gmra.mrb[12].mxu0 %vm276_vm0, %v252_v31 }
  0x2d   : > { %768 = vmatpush3.bf16.msra.mxu0 %v819_v32 }
  0x2e   : > { %769 = vmatprep.subr.bf16.mxu0 %v820_v33 }
  0x31   : > { %770 = vmatpush3.bf16.msra.mxu0 %v820_v33 }
  0xe7   : > { %v741_v35 = vpop.f32.mrb[0].mxu0 }
  0xe8   : > { %v344_v36 = vadd.f32 %v741_v35, %v687_v34  ;;  %v335_v37 = vpop.f32.mrb[1].mxu0 }
  0xe9   : > { %v336_v38 = vadd.f32 %v687_v34, %v335_v37  ;;  %v742_v39 = vpop.f32.mrb[2].mxu0 }
  0xea   : > { %v347_v40 = vadd.f32 %v742_v39, %v687_v34  ;;  %v338_v41 = vpop.f32.mrb[3].mxu0  ;;  %v400_v43 = vmax.f32 %v344_v36, 0.0 }
  0xeb   : > { %v339_v42 = vadd.f32 %v687_v34, %v338_v41  ;;  %v398_v45 = vmax.f32 %v336_v38, 0.0 }
  0xec   : > { %v401_v44 = vmax.f32 %v347_v40, 0.0 }
  0xed   : > { %v399_v46 = vmax.f32 %v339_v42, 0.0 }
  0xee   : > { %v415_v47 = vpack.c.bf16 %v401_v44, %v400_v43 }
  0xef   : > { %v414_v48 = vpack.c.bf16 %v399_v46, %v398_v45  ;;  %v745_v49 = vpop.f32.mrb[4].mxu0 }
  0xf0   : > { %v360_v50 = vadd.f32 %v745_v49, %v687_v34  ;;  %v351_v51 = vpop.f32.mrb[5].mxu0 }
  0xf1   : > { %v352_v52 = vadd.f32 %v687_v34, %v351_v51  ;;  %v746_v53 = vpop.f32.mrb[6].mxu0  ;;  %771 = vmatprep.mubr.bf16.mxu0 %v414_v48 }
  0xf2   : > { %v363_v54 = vadd.f32 %v746_v53, %v687_v34  ;;  %v354_v55 = vpop.f32.mrb[7].mxu0  ;;  %772 = vmatmul.mubr.bf16.vlgmr.msra.gmra.mrb[16].mxu0 %v415_v47  ;;  %v404_v57 = vmax.f32 %v360_v50, 0.0 }
  0xf3   : > { %v355_v56 = vadd.f32 %v687_v34, %v354_v55  ;;  %v402_v59 = vmax.f32 %v352_v52, 0.0 }
  0xf4   : > { %v405_v58 = vmax.f32 %v363_v54, 0.0 }
  0xf5   : > { %v403_v60 = vmax.f32 %v355_v56, 0.0 }
  0xf6   : > { %v417_v61 = vpack.c.bf16 %v405_v58, %v404_v57 }
  0xf7   : > { %v749_v62 = vpop.f32.mrb[8].mxu0  ;;  %v416_v63 = vpack.c.bf16 %v403_v60, %v402_v59 }
  0xf8   : > { %v376_v0 = vadd.f32 %v749_v62, %v687_v34  ;;  %v367_v1 = vpop.f32.mrb[9].mxu0 }
  0xf9   : > { %v368_v2 = vadd.f32 %v687_v34, %v367_v1  ;;  %v750_v3 = vpop.f32.mrb[10].mxu0  ;;  %775 = vmatprep.mubr.bf16.mxu1 %v416_v63 }
  0xfa   : > { %v379_v4 = vadd.f32 %v750_v3, %v687_v34  ;;  %v370_v5 = vpop.f32.mrb[11].mxu0  ;;  %776 = vmatmul.mubr.bf16.vlgmr.msra.gmra.mrb[0].mxu1 %v417_v61  ;;  %v408_v7 = vmax.f32 %v376_v0, 0.0 }
  0xfb   : > { %v371_v6 = vadd.f32 %v687_v34, %v370_v5  ;;  %v406_v9 = vmax.f32 %v368_v2, 0.0 }
  0xfc   : > { %v409_v8 = vmax.f32 %v379_v4, 0.0 }
  0xfd   : > { %v407_v10 = vmax.f32 %v371_v6, 0.0 }
  0xfe   : > { %v419_v11 = vpack.c.bf16 %v409_v8, %v408_v7 }
  0xff   : > { %v418_v12 = vpack.c.bf16 %v407_v10, %v406_v9  ;;  %v753_v13 = vpop.f32.mrb[12].mxu0 }
 0x100   : > { %v392_v14 = vadd.f32 %v753_v13, %v687_v34  ;;  %v383_v15 = vpop.f32.mrb[13].mxu0 }
 0x101   : > { %v384_v16 = vadd.f32 %v687_v34, %v383_v15  ;;  %v754_v17 = vpop.f32.mrb[14].mxu0  ;;  %779 = vmatprep.mubr.bf16.mxu1 %v418_v12 }
 0x102   : > { %v395_v18 = vadd.f32 %v754_v17, %v687_v34  ;;  %v386_v19 = vpop.f32.mrb[15].mxu0  ;;  %780 = vmatmul.mubr.bf16.gmra.mrb[4].mxu1 %v419_v11  ;;  %v412_v21 = vmax.f32 %v392_v14, 0.0 }
 0x103   : > { %v387_v20 = vadd.f32 %v687_v34, %v386_v19  ;;  %v410_v23 = vmax.f32 %v384_v16, 0.0 }
 0x104   : > { %v413_v22 = vmax.f32 %v395_v18, 0.0 }
 0x105   : > { %v411_v24 = vmax.f32 %v387_v20, 0.0 }
 0x106   : > { %v421_v25 = vpack.c.bf16 %v413_v22, %v412_v21 }
 0x107   : > { %v420_v26 = vpack.c.bf16 %v411_v24, %v410_v23 }
 0x109   : > { %783 = vmatprep.mubr.bf16.mxu1 %v420_v26 }
 0x10a   : > { %784 = vmatmul.mubr.bf16.gmra.mrb[8].mxu1 %v421_v25 }
 0x1c5   : > { %v773_v28 = vpop.f32.mrb[16].mxu0 }
 0x1c6   : > { %v536_v29 = vadd.f32 %v773_v28, %v698_v27  ;;  %v527_v30 = vpop.f32.mrb[17].mxu0 }
 0x1c7   : > { %v528_v31 = vadd.f32 %v698_v27, %v527_v30  ;;  %v774_v32 = vpop.f32.mrb[18].mxu0 }
 0x1c8   : > { %v592_v33 = vmax.f32 %v536_v29, 0.0  ;;  %v539_v34 = vadd.f32 %v774_v32, %v698_v27  ;;  %v530_v35 = vpop.f32.mrb[19].mxu0 }
 0x1c9   : > { %v590_v36 = vmax.f32 %v528_v31, 0.0  ;;  %v531_v37 = vadd.f32 %v698_v27, %v530_v35 }
 0x1ca   : > { %608 = vst.msk [vmem:[%s942_s28 + $0x10] sm:$0xff] %vm276_vm0, %v592_v33  ;;  %v593_v38 = vmax.f32 %v539_v34, 0.0 }
 0x1cb   : > { %606 = vst.msk [vmem:[%s942_s28] sm:$0xff] %vm276_vm0, %v590_v36  ;;  %v591_v39 = vmax.f32 %v531_v37, 0.0 }
 0x1cc   : > { %609 = vst.msk [vmem:[%s942_s28 + $0x18] sm:$0xff] %vm276_vm0, %v593_v38 }
 0x1cd   : > { %607 = vst.msk [vmem:[%s942_s28 + $0x8] sm:$0xff] %vm276_vm0, %v591_v39  ;;  %v777_v40 = vpop.f32.mrb[0].mxu1 }
 0x1ce   : > { %v552_v41 = vadd.f32 %v777_v40, %v698_v27  ;;  %v543_v42 = vpop.f32.mrb[1].mxu1 }
 0x1cf   : > { %v544_v43 = vadd.f32 %v698_v27, %v543_v42  ;;  %v778_v44 = vpop.f32.mrb[2].mxu1 }
 0x1d0   : > { %v596_v45 = vmax.f32 %v552_v41, 0.0  ;;  %v555_v46 = vadd.f32 %v778_v44, %v698_v27  ;;  %v546_v47 = vpop.f32.mrb[3].mxu1 }
 0x1d1   : > { %v594_v48 = vmax.f32 %v544_v43, 0.0  ;;  %v547_v49 = vadd.f32 %v698_v27, %v546_v47 }
 0x1d2   : > { %612 = vst.msk [vmem:[%s942_s28 + $0x30] sm:$0xff] %vm276_vm0, %v596_v45  ;;  %v597_v50 = vmax.f32 %v555_v46, 0.0 }
 0x1d3   : > { %610 = vst.msk [vmem:[%s942_s28 + $0x20] sm:$0xff] %vm276_vm0, %v594_v48  ;;  %v595_v51 = vmax.f32 %v547_v49, 0.0 }
 0x1d4   : > { %613 = vst.msk [vmem:[%s942_s28 + $0x38] sm:$0xff] %vm276_vm0, %v597_v50 }
 0x1d5   : > { %611 = vst.msk [vmem:[%s942_s28 + $0x28] sm:$0xff] %vm276_vm0, %v595_v51  ;;  %v781_v52 = vpop.f32.mrb[4].mxu1 }
 0x1d6   : > { %v568_v53 = vadd.f32 %v781_v52, %v698_v27  ;;  %v559_v54 = vpop.f32.mrb[5].mxu1 }
 0x1d7   : > { %v560_v55 = vadd.f32 %v698_v27, %v559_v54  ;;  %v782_v56 = vpop.f32.mrb[6].mxu1 }
 0x1d8   : > { %v600_v57 = vmax.f32 %v568_v53, 0.0  ;;  %v571_v58 = vadd.f32 %v782_v56, %v698_v27  ;;  %v562_v59 = vpop.f32.mrb[7].mxu1 }
 0x1d9   : > { %v598_v60 = vmax.f32 %v560_v55, 0.0  ;;  %v563_v61 = vadd.f32 %v698_v27, %v562_v59 }
 0x1da   : > { %616 = vst.msk [vmem:[%s942_s28 + $0x50] sm:$0xff] %vm276_vm0, %v600_v57  ;;  %v601_v62 = vmax.f32 %v571_v58, 0.0 }
 0x1db   : > { %614 = vst.msk [vmem:[%s942_s28 + $0x40] sm:$0xff] %vm276_vm0, %v598_v60  ;;  %v599_v63 = vmax.f32 %v563_v61, 0.0 }
 0x1dc   : > { %617 = vst.msk [vmem:[%s942_s28 + $0x58] sm:$0xff] %vm276_vm0, %v601_v62 }
 0x1dd   : > { %615 = vst.msk [vmem:[%s942_s28 + $0x48] sm:$0xff] %vm276_vm0, %v599_v63  ;;  %v785_v0 = vpop.f32.mrb[8].mxu1 }
 0x1de   : > { %v584_v1 = vadd.f32 %v785_v0, %v698_v27  ;;  %v575_v2 = vpop.f32.mrb[9].mxu1 }
 0x1df   : > { %v576_v3 = vadd.f32 %v698_v27, %v575_v2  ;;  %v786_v4 = vpop.f32.mrb[10].mxu1 }
 0x1e0   : > { %v604_v5 = vmax.f32 %v584_v1, 0.0  ;;  %v587_v6 = vadd.f32 %v786_v4, %v698_v27  ;;  %v578_v7 = vpop.f32.mrb[11].mxu1 }
 0x1e1   : > { %v602_v8 = vmax.f32 %v576_v3, 0.0  ;;  %v579_v9 = vadd.f32 %v698_v27, %v578_v7 }
 0x1e2   : > { %620 = vst.msk [vmem:[%s942_s28 + $0x70] sm:$0xff] %vm276_vm0, %v604_v5  ;;  %v605_v10 = vmax.f32 %v587_v6, 0.0 }
 0x1e3   : > { %618 = vst.msk [vmem:[%s942_s28 + $0x60] sm:$0xff] %vm276_vm0, %v602_v8  ;;  %v603_v11 = vmax.f32 %v579_v9, 0.0 }
 0x1e4   : > { %621 = vst.msk [vmem:[%s942_s28 + $0x78] sm:$0xff] %vm276_vm0, %v605_v10 }
 0x1e5   : > { %619 = vst.msk [vmem:[%s942_s28 + $0x68] sm:$0xff] %vm276_vm0, %v603_v11 }
 0x1e6 PF: > { %s15_s18 = sadd.s32 1, %s827_s18  }
 0x1e7   : > { %p12_p4 = scmp.ge.s32.totalorder %s15_s18, 4  }
 0x1e9   :  { %14 = sbr.rel (!%p12_p4) target bundleno = 1 (0x1), region = 70 }

</bundles_post_ra>
